<compile_context>
chip_gen: v5e
topology: v5e:2x2
jax: 0.10.0
libtpu: 0.0.40
codegen_flags: <defaults>
</compile_context>

<pallas_src>
import jax
import jax.numpy as jnp
from jax import lax
from jax.experimental import pallas as pl
from jax.experimental.pallas import tpu as pltpu


def _round_up(x, m):
    return (x + m - 1) // m * m


def rnn_forward(x, params, *, time_chunk=32):
    """x: (B, T, I) float32 -> (B, O) float32 (matches the PyTorch RNN.forward)."""
    w_ih, b_ih, w_hh, b_hh, w_fc, b_fc = params
    B, T, I = x.shape
    H = w_ih.shape[0]

    # ---- padded / tiled shapes -------------------------------------------
    Bp = _round_up(B, 16)      # bf16 sublane tile (16 packed sublanes per vreg)
    Ip = _round_up(I, 128)     # lanes
    Hp = _round_up(H, 128)     # lanes
    Tc = min(T, time_chunk)    # timesteps per grid step (in-kernel loop)
    n_chunks = -(-T // Tc)
    Tp = n_chunks * Tc
    mask_tail = (T % Tc) != 0

    # x: (B, T, I) -> time-major, zero-padded, bf16 (fused pad/transpose/cast in XLA)
    x_p = jnp.zeros((Tp, Bp, Ip), jnp.float32)
    x_p = x_p.at[:T, :B, :I].set(jnp.transpose(x, (1, 0, 2))).astype(jnp.bfloat16)

    # Pre-transposed, zero-padded weights (padding is exact: padded hidden units
    # get zero weights + zero bias -> tanh(0) = 0 forever).
    wih_t = jnp.zeros((Ip, Hp), jnp.float32).at[:I, :H].set(w_ih.T).astype(jnp.bfloat16)
    whh_t = jnp.zeros((Hp, Hp), jnp.float32).at[:H, :H].set(w_hh.T).astype(jnp.bfloat16)
    bias = jnp.zeros((1, Hp), jnp.float32).at[0, :H].set(b_ih + b_hh)   # fused biases

    full_unroll = Hp <= 1024   # cap vreg pressure at large H

    # ---- kernel -----------------------------------------------------------
    def kernel(x_ref, wih_ref, whh_ref, b_ref, h_ref, precomp_ref):
        c = pl.program_id(0)

        @pl.when(c == 0)
        def _():
            h_ref[...] = jnp.zeros_like(h_ref)

        # Per-chunk precompute: all Tc input projections + fused bias in one
        # MXU-shaped matmul, written to VMEM scratch (off the serial path).
        x_flat = x_ref[...].reshape(Tc * Bp, Ip)                       # bf16
        pre_all = jnp.dot(x_flat, wih_ref[...],
                          preferred_element_type=jnp.float32) + b_ref[...]
        precomp_ref[...] = pre_all.reshape(Tc, Bp, Hp)

        def step(s, h, mask):
            # Note: h -> bf16 each step accumulates rounding over long T; keep
            # f32 recurrent matmul if long-sequence accuracy ever matters.
            pre = precomp_ref[s] + jnp.dot(h.astype(jnp.bfloat16), whh_ref[...],
                                           preferred_element_type=jnp.float32)
            h_new = jnp.tanh(pre)
            if mask:                      # only emitted on the last-chunk path
                h_new = jnp.where(c * Tc + s < T, h_new, h)
            return h_new

        def run_chunk(mask):
            h = h_ref[...]                                     # (Bp, Hp) f32
            if full_unroll:
                for s in range(Tc):                            # small Hp: unroll
                    h = step(s, h, mask)
            else:                                              # large Hp: bound live ranges
                h = lax.fori_loop(0, Tc, lambda s, hh: step(s, hh, mask), h,
                                  unroll=min(8, Tc))
            h_ref[...] = h                                     # spill once per chunk

        if mask_tail:
            last = n_chunks - 1

            @pl.when(c == last)
            def _():
                run_chunk(True)

            @pl.when(c != last)
            def _():
                run_chunk(False)
        else:
            run_chunk(False)

    # ---- constant-index blocks: single-buffer when large ------------------
    const_spec_kwargs = {}
    if Hp >= 2048:
        # Their index maps never change; double-buffering is pure VMEM waste
        # (critical on v7x's 64 MiB VMEM at large H).
        const_spec_kwargs = dict(pipeline_mode=pl.Buffered(1))
    weight_bufs = 1 if Hp >= 2048 else 2

    # ---- VMEM budget (generation-aware cap) --------------------------------
    bytes_needed = (2 * Tc * Bp * Ip * 2                    # x chunk, bf16, 2x buffered
                    + weight_bufs * (Ip * Hp + Hp * Hp) * 2  # weights, bf16
                    + 2 * Hp * 4                             # bias
                    + 2 * Bp * Hp * 4                        # resident h / output block
                    + Tc * Bp * Hp * 4)                      # precompute scratch
    try:
        vmem_cap = int(pltpu.get_tpu_info().vmem_capacity_bytes)
    except Exception:
        vmem_cap = 64 * 1024 * 1024   # conservative: v7x per-TensorCore VMEM
    vmem_limit = None
    if bytes_needed > 12 * 1024 * 1024:     # below every generation's default scoped limit
        vmem_limit = min(int(bytes_needed * 3 // 2), int(vmem_cap * 0.85))

    h_T = pl.pallas_call(
        kernel,
        out_shape=jax.ShapeDtypeStruct((Bp, Hp), jnp.float32),
        grid_spec=pltpu.PrefetchScalarGridSpec(
            num_scalar_prefetch=0,
            grid=(n_chunks,),
            in_specs=[
                pl.BlockSpec((Tc, Bp, Ip), lambda c: (c, 0, 0)),                  # x chunk
                pl.BlockSpec((Ip, Hp), lambda c: (0, 0), **const_spec_kwargs),    # W_ih^T
                pl.BlockSpec((Hp, Hp), lambda c: (0, 0), **const_spec_kwargs),    # W_hh^T
                pl.BlockSpec((1, Hp), lambda c: (0, 0), **const_spec_kwargs),     # fused bias
            ],
            out_specs=pl.BlockSpec((Bp, Hp), lambda c: (0, 0)),   # h carrier / h_T
            scratch_shapes=[pltpu.VMEM((Tc, Bp, Hp), jnp.float32)],  # per-chunk precompute
        ),
        compiler_params=pltpu.CompilerParams(
            dimension_semantics=("arbitrary",),    # sequential recurrence over time chunks
            vmem_limit_bytes=vmem_limit,
        ),
    )(x_p, wih_t, whh_t, bias)

    # Final Linear done once in plain XLA on the last hidden state (keeps W_fc
    # out of VMEM for the whole recurrence; kernel output stays lane-dense in H).
    h_last = h_T[:B, :H]
    return h_last @ w_fc.T + b_fc


def rnn_reference(x, params):
    """Pure-JAX f32 reference mirroring the PyTorch forward."""
    w_ih, b_ih, w_hh, b_hh, w_fc, b_fc = params
    B, T, _ = x.shape
    H = w_ih.shape[0]
    h = jnp.zeros((B, H), jnp.float32)
    for t in range(T):
        h = jnp.tanh(x[:, t, :] @ w_ih.T + b_ih + h @ w_hh.T + b_hh)
    return h @ w_fc.T + b_fc


def init_params(key, input_size, hidden_size, output_size):
    """Deterministic init matching nn.Linear parameter shapes (out, in)."""
    ks = jax.random.split(key, 6)

    def lin(kw, kb, fan_in, fan_out):
        bound = 1.0 / jnp.sqrt(fan_in)
        w = jax.random.uniform(kw, (fan_out, fan_in), jnp.float32, -bound, bound)
        b = jax.random.uniform(kb, (fan_out,), jnp.float32, -bound, bound)
        return w, b

    w_ih, b_ih = lin(ks[0], ks[1], input_size, hidden_size)
    w_hh, b_hh = lin(ks[2], ks[3], hidden_size, hidden_size)
    w_fc, b_fc = lin(ks[4], ks[5], hidden_size, output_size)
    return (w_ih, b_ih, w_hh, b_hh, w_fc, b_fc)


if __name__ == "__main__":
    key = jax.random.PRNGKey(0)
    k_x, k_p = jax.random.split(key)

    batch, seq_len, input_size = 2, 8, 4
    hidden_size, output_size = 32, 4

    x = jax.random.normal(k_x, (batch, seq_len, input_size), jnp.float32)
    params = init_params(k_p, input_size, hidden_size, output_size)

    out = rnn_forward(x, params)
    out = jax.block_until_ready(out)

    ref = rnn_reference(x, params)
    assert out.shape == (batch, output_size)
    # bf16 matmul operands (f32 accumulation) -> slightly loosened tolerance.
    assert jnp.allclose(out, ref, atol=3e-2, rtol=3e-2), (out, ref)

    print("KERNEL_OK")
</pallas_src>

<mosaic_0001>
module attributes {stable_mosaic.version = 11 : i64} {
  func.func @kernel(%arg0: i32, %arg1: memref<8x16x128xbf16, #tpu.memory_space<vmem>>, %arg2: memref<128x128xbf16, #tpu.memory_space<vmem>>, %arg3: memref<128x128xbf16, #tpu.memory_space<vmem>>, %arg4: memref<1x128xf32, #tpu.memory_space<vmem>>, %arg5: memref<16x128xf32, #tpu.memory_space<vmem>>, %arg6: memref<8x16x128xf32, #tpu.memory_space<vmem>>) attributes {dimension_semantics = [#tpu.dimension_semantics<arbitrary>], iteration_bounds = array<i64: 1>, scalar_prefetch = 0 : i64, scratch_operands = 1 : i64, tpu.core_type = #tpu.core_type<tc>, window_params = [{transform_indices = @transform_0, window_bounds = array<i64: 8, 16, 128>}, {pipeline_mode = #tpu.pipeline_mode<synchronous>, transform_indices = @transform_1, window_bounds = array<i64: 128, 128>}, {pipeline_mode = #tpu.pipeline_mode<synchronous>, transform_indices = @transform_2, window_bounds = array<i64: 128, 128>}, {pipeline_mode = #tpu.pipeline_mode<synchronous>, transform_indices = @transform_3, window_bounds = array<i64: 1, 128>}, {pipeline_mode = #tpu.pipeline_mode<synchronous>, transform_indices = @transform_4, window_bounds = array<i64: 16, 128>}]} {
    %c0_i32 = arith.constant 0 : i32
    %0 = arith.cmpi eq, %arg0, %c0_i32 : i32
    %1 = arith.extui %0 : i1 to i32
    %c0_i32_0 = arith.constant 0 : i32
    %2 = arith.cmpi ne, %1, %c0_i32_0 : i32
    scf.if %2 {
      %cst_55 = arith.constant 0.000000e+00 : f32
      %70 = vector.broadcast %cst_55 : f32 to vector<16x128xf32>
      %c0_56 = arith.constant 0 : index
      %c0_57 = arith.constant 0 : index
      %71 = vector.load %arg5[%c0_56, %c0_57] : memref<16x128xf32, #tpu.memory_space<vmem>>, vector<16x128xf32>
      tpu.vector_store %arg5[%c0_56, %c0_57], %70 {strides = array<i32>} : memref<16x128xf32, #tpu.memory_space<vmem>>, vector<16x128xf32>,
    } else {
    }
    %c0 = arith.constant 0 : index
    %c0_1 = arith.constant 0 : index
    %c0_2 = arith.constant 0 : index
    %3 = vector.load %arg1[%c0, %c0_1, %c0_2] : memref<8x16x128xbf16, #tpu.memory_space<vmem>>, vector<8x16x128xbf16>
    %4 = vector.shape_cast %3 : vector<8x16x128xbf16> to vector<128x128xbf16>
    %c0_3 = arith.constant 0 : index
    %c0_4 = arith.constant 0 : index
    %5 = vector.load %arg2[%c0_3, %c0_4] : memref<128x128xbf16, #tpu.memory_space<vmem>>, vector<128x128xbf16>
    %cst = arith.constant dense<0.000000e+00> : vector<128x128xf32>
    %6 = tpu.matmul %4, %5, %cst {dimension_numbers = #tpu.dot_dimension_numbers<[1], [0], [0], [1], [0, 0, 1, 1], [], []>} : vector<128x128xbf16>, vector<128x128xbf16>, vector<128x128xf32> -> vector<128x128xf32>
    %c0_5 = arith.constant 0 : index
    %c0_6 = arith.constant 0 : index
    %7 = vector.load %arg4[%c0_5, %c0_6] : memref<1x128xf32, #tpu.memory_space<vmem>>, vector<1x128xf32>
    %8 = vector.broadcast %7 : vector<1x128xf32> to vector<128x128xf32>
    %9 = arith.addf %6, %8 : vector<128x128xf32>
    %10 = vector.shape_cast %9 : vector<128x128xf32> to vector<8x16x128xf32>
    %c0_7 = arith.constant 0 : index
    %c0_8 = arith.constant 0 : index
    %c0_9 = arith.constant 0 : index
    %11 = vector.load %arg6[%c0_7, %c0_8, %c0_9] : memref<8x16x128xf32, #tpu.memory_space<vmem>>, vector<8x16x128xf32>
    tpu.vector_store %arg6[%c0_7, %c0_8, %c0_9], %10 {strides = array<i32>} : memref<8x16x128xf32, #tpu.memory_space<vmem>>, vector<8x16x128xf32>,
    %c0_10 = arith.constant 0 : index
    %c0_11 = arith.constant 0 : index
    %12 = vector.load %arg5[%c0_10, %c0_11] : memref<16x128xf32, #tpu.memory_space<vmem>>, vector<16x128xf32>
    %c0_12 = arith.constant 0 : index
    %c0_13 = arith.constant 0 : index
    %c0_14 = arith.constant 0 : index
    %13 = vector.load %arg6[%c0_12, %c0_13, %c0_14] : memref<8x16x128xf32, #tpu.memory_space<vmem>>, vector<1x16x128xf32>
    %14 = vector.shape_cast %13 : vector<1x16x128xf32> to vector<16x128xf32>
    %15 = arith.truncf %12 : vector<16x128xf32> to vector<16x128xbf16>
    %c0_15 = arith.constant 0 : index
    %c0_16 = arith.constant 0 : index
    %16 = vector.load %arg3[%c0_15, %c0_16] : memref<128x128xbf16, #tpu.memory_space<vmem>>, vector<128x128xbf16>
    %cst_17 = arith.constant dense<0.000000e+00> : vector<16x128xf32>
    %17 = tpu.matmul %15, %16, %cst_17 {dimension_numbers = #tpu.dot_dimension_numbers<[1], [0], [0], [1], [0, 0, 1, 1], [], []>} : vector<16x128xbf16>, vector<128x128xbf16>, vector<16x128xf32> -> vector<16x128xf32>
    %18 = arith.addf %14, %17 : vector<16x128xf32>
    %19 = math.tanh %18 : vector<16x128xf32>
    %c1 = arith.constant 1 : index
    %c0_18 = arith.constant 0 : index
    %c0_19 = arith.constant 0 : index
    %20 = vector.load %arg6[%c1, %c0_18, %c0_19] : memref<8x16x128xf32, #tpu.memory_space<vmem>>, vector<1x16x128xf32>
    %21 = vector.shape_cast %20 : vector<1x16x128xf32> to vector<16x128xf32>
    %22 = arith.truncf %19 : vector<16x128xf32> to vector<16x128xbf16>
    %c0_20 = arith.constant 0 : index
    %c0_21 = arith.constant 0 : index
    %23 = vector.load %arg3[%c0_20, %c0_21] : memref<128x128xbf16, #tpu.memory_space<vmem>>, vector<128x128xbf16>
    %cst_22 = arith.constant dense<0.000000e+00> : vector<16x128xf32>
    %24 = tpu.matmul %22, %23, %cst_22 {dimension_numbers = #tpu.dot_dimension_numbers<[1], [0], [0], [1], [0, 0, 1, 1], [], []>} : vector<16x128xbf16>, vector<128x128xbf16>, vector<16x128xf32> -> vector<16x128xf32>
    %25 = arith.addf %21, %24 : vector<16x128xf32>
    %26 = math.tanh %25 : vector<16x128xf32>
    %c2 = arith.constant 2 : index
    %c0_23 = arith.constant 0 : index
    %c0_24 = arith.constant 0 : index
    %27 = vector.load %arg6[%c2, %c0_23, %c0_24] : memref<8x16x128xf32, #tpu.memory_space<vmem>>, vector<1x16x128xf32>
    %28 = vector.shape_cast %27 : vector<1x16x128xf32> to vector<16x128xf32>
    %29 = arith.truncf %26 : vector<16x128xf32> to vector<16x128xbf16>
    %c0_25 = arith.constant 0 : index
    %c0_26 = arith.constant 0 : index
    %30 = vector.load %arg3[%c0_25, %c0_26] : memref<128x128xbf16, #tpu.memory_space<vmem>>, vector<128x128xbf16>
    %cst_27 = arith.constant dense<0.000000e+00> : vector<16x128xf32>
    %31 = tpu.matmul %29, %30, %cst_27 {dimension_numbers = #tpu.dot_dimension_numbers<[1], [0], [0], [1], [0, 0, 1, 1], [], []>} : vector<16x128xbf16>, vector<128x128xbf16>, vector<16x128xf32> -> vector<16x128xf32>
    %32 = arith.addf %28, %31 : vector<16x128xf32>
    %33 = math.tanh %32 : vector<16x128xf32>
    %c3 = arith.constant 3 : index
    %c0_28 = arith.constant 0 : index
    %c0_29 = arith.constant 0 : index
    %34 = vector.load %arg6[%c3, %c0_28, %c0_29] : memref<8x16x128xf32, #tpu.memory_space<vmem>>, vector<1x16x128xf32>
    %35 = vector.shape_cast %34 : vector<1x16x128xf32> to vector<16x128xf32>
    %36 = arith.truncf %33 : vector<16x128xf32> to vector<16x128xbf16>
    %c0_30 = arith.constant 0 : index
    %c0_31 = arith.constant 0 : index
    %37 = vector.load %arg3[%c0_30, %c0_31] : memref<128x128xbf16, #tpu.memory_space<vmem>>, vector<128x128xbf16>
    %cst_32 = arith.constant dense<0.000000e+00> : vector<16x128xf32>
    %38 = tpu.matmul %36, %37, %cst_32 {dimension_numbers = #tpu.dot_dimension_numbers<[1], [0], [0], [1], [0, 0, 1, 1], [], []>} : vector<16x128xbf16>, vector<128x128xbf16>, vector<16x128xf32> -> vector<16x128xf32>
    %39 = arith.addf %35, %38 : vector<16x128xf32>
    %40 = math.tanh %39 : vector<16x128xf32>
    %c4 = arith.constant 4 : index
    %c0_33 = arith.constant 0 : index
    %c0_34 = arith.constant 0 : index
    %41 = vector.load %arg6[%c4, %c0_33, %c0_34] : memref<8x16x128xf32, #tpu.memory_space<vmem>>, vector<1x16x128xf32>
    %42 = vector.shape_cast %41 : vector<1x16x128xf32> to vector<16x128xf32>
    %43 = arith.truncf %40 : vector<16x128xf32> to vector<16x128xbf16>
    %c0_35 = arith.constant 0 : index
    %c0_36 = arith.constant 0 : index
    %44 = vector.load %arg3[%c0_35, %c0_36] : memref<128x128xbf16, #tpu.memory_space<vmem>>, vector<128x128xbf16>
    %cst_37 = arith.constant dense<0.000000e+00> : vector<16x128xf32>
    %45 = tpu.matmul %43, %44, %cst_37 {dimension_numbers = #tpu.dot_dimension_numbers<[1], [0], [0], [1], [0, 0, 1, 1], [], []>} : vector<16x128xbf16>, vector<128x128xbf16>, vector<16x128xf32> -> vector<16x128xf32>
    %46 = arith.addf %42, %45 : vector<16x128xf32>
    %47 = math.tanh %46 : vector<16x128xf32>
    %c5 = arith.constant 5 : index
    %c0_38 = arith.constant 0 : index
    %c0_39 = arith.constant 0 : index
    %48 = vector.load %arg6[%c5, %c0_38, %c0_39] : memref<8x16x128xf32, #tpu.memory_space<vmem>>, vector<1x16x128xf32>
    %49 = vector.shape_cast %48 : vector<1x16x128xf32> to vector<16x128xf32>
    %50 = arith.truncf %47 : vector<16x128xf32> to vector<16x128xbf16>
    %c0_40 = arith.constant 0 : index
    %c0_41 = arith.constant 0 : index
    %51 = vector.load %arg3[%c0_40, %c0_41] : memref<128x128xbf16, #tpu.memory_space<vmem>>, vector<128x128xbf16>
    %cst_42 = arith.constant dense<0.000000e+00> : vector<16x128xf32>
    %52 = tpu.matmul %50, %51, %cst_42 {dimension_numbers = #tpu.dot_dimension_numbers<[1], [0], [0], [1], [0, 0, 1, 1], [], []>} : vector<16x128xbf16>, vector<128x128xbf16>, vector<16x128xf32> -> vector<16x128xf32>
    %53 = arith.addf %49, %52 : vector<16x128xf32>
    %54 = math.tanh %53 : vector<16x128xf32>
    %c6 = arith.constant 6 : index
    %c0_43 = arith.constant 0 : index
    %c0_44 = arith.constant 0 : index
    %55 = vector.load %arg6[%c6, %c0_43, %c0_44] : memref<8x16x128xf32, #tpu.memory_space<vmem>>, vector<1x16x128xf32>
    %56 = vector.shape_cast %55 : vector<1x16x128xf32> to vector<16x128xf32>
    %57 = arith.truncf %54 : vector<16x128xf32> to vector<16x128xbf16>
    %c0_45 = arith.constant 0 : index
    %c0_46 = arith.constant 0 : index
    %58 = vector.load %arg3[%c0_45, %c0_46] : memref<128x128xbf16, #tpu.memory_space<vmem>>, vector<128x128xbf16>
    %cst_47 = arith.constant dense<0.000000e+00> : vector<16x128xf32>
    %59 = tpu.matmul %57, %58, %cst_47 {dimension_numbers = #tpu.dot_dimension_numbers<[1], [0], [0], [1], [0, 0, 1, 1], [], []>} : vector<16x128xbf16>, vector<128x128xbf16>, vector<16x128xf32> -> vector<16x128xf32>
    %60 = arith.addf %56, %59 : vector<16x128xf32>
    %61 = math.tanh %60 : vector<16x128xf32>
    %c7 = arith.constant 7 : index
    %c0_48 = arith.constant 0 : index
    %c0_49 = arith.constant 0 : index
    %62 = vector.load %arg6[%c7, %c0_48, %c0_49] : memref<8x16x128xf32, #tpu.memory_space<vmem>>, vector<1x16x128xf32>
    %63 = vector.shape_cast %62 : vector<1x16x128xf32> to vector<16x128xf32>
    %64 = arith.truncf %61 : vector<16x128xf32> to vector<16x128xbf16>
    %c0_50 = arith.constant 0 : index
    %c0_51 = arith.constant 0 : index
    %65 = vector.load %arg3[%c0_50, %c0_51] : memref<128x128xbf16, #tpu.memory_space<vmem>>, vector<128x128xbf16>
    %cst_52 = arith.constant dense<0.000000e+00> : vector<16x128xf32>
    %66 = tpu.matmul %64, %65, %cst_52 {dimension_numbers = #tpu.dot_dimension_numbers<[1], [0], [0], [1], [0, 0, 1, 1], [], []>} : vector<16x128xbf16>, vector<128x128xbf16>, vector<16x128xf32> -> vector<16x128xf32>
    %67 = arith.addf %63, %66 : vector<16x128xf32>
    %68 = math.tanh %67 : vector<16x128xf32>
    %c0_53 = arith.constant 0 : index
    %c0_54 = arith.constant 0 : index
    %69 = vector.load %arg5[%c0_53, %c0_54] : memref<16x128xf32, #tpu.memory_space<vmem>>, vector<16x128xf32>
    tpu.vector_store %arg5[%c0_53, %c0_54], %68 {strides = array<i32>} : memref<16x128xf32, #tpu.memory_space<vmem>>, vector<16x128xf32>,
    return
  }
  func.func @transform_0(%arg0: i32) -> (i32, i32, i32) {
    %c0_i32 = arith.constant 0 : i32
    %c0_i32_0 = arith.constant 0 : i32
    %c0_i32_1 = arith.constant 0 : i32
    return %arg0, %c0_i32, %c0_i32_0 : i32, i32, i32
  }
  func.func @transform_1(%arg0: i32) -> (i32, i32) {
    %c0_i32 = arith.constant 0 : i32
    %c0_i32_0 = arith.constant 0 : i32
    %c0_i32_1 = arith.constant 0 : i32
    return %c0_i32, %c0_i32_0 : i32, i32
  }
  func.func @transform_2(%arg0: i32) -> (i32, i32) {
    %c0_i32 = arith.constant 0 : i32
    %c0_i32_0 = arith.constant 0 : i32
    %c0_i32_1 = arith.constant 0 : i32
    return %c0_i32, %c0_i32_0 : i32, i32
  }
  func.func @transform_3(%arg0: i32) -> (i32, i32) {
    %c0_i32 = arith.constant 0 : i32
    %c0_i32_0 = arith.constant 0 : i32
    %c0_i32_1 = arith.constant 0 : i32
    return %c0_i32, %c0_i32_0 : i32, i32
  }
  func.func @transform_4(%arg0: i32) -> (i32, i32) {
    %c0_i32 = arith.constant 0 : i32
    %c0_i32_0 = arith.constant 0 : i32
    %c0_i32_1 = arith.constant 0 : i32
    return %c0_i32, %c0_i32_0 : i32, i32
  }
}

</mosaic_0001>

<bundles_post_ra>
// kernel: tpu_custom_call.1
= control target key start
LH: loop header
LB: loop body
LE: loop exit
PB: predicated region body
PF: predicated region fallthrough
CT: control target
= control target key end

     0   :  { %9 = vsyncpa [#allocation4], 0  ;;  %s962_s0 = inlined_call_operand.hbm [shape: bf16[8,16,128], index: 0, kind: input, shape index: {}]   ;;  %s963_s1 = inlined_call_operand.hbm [shape: bf16[128,128], index: 1, kind: input, shape index: {}]   ;;  %s964_s2 = inlined_call_operand.hbm [shape: bf16[128,128], index: 2, kind: input, shape index: {}]   ;;  %s965_s3 = inlined_call_operand.vmem [shape: f32[1,128], index: 3, kind: input, shape index: {}]   ;;  %s966_s4 = inlined_call_operand.hbm [shape: f32[16,128], index: 4, kind: output, shape index: {}]  }
   0x1   :  { %10 = vsyncpa [#allocation7], 0 }
   0x2   :  { %11 = vsyncpa [#allocation5], 0  ;;  %s29_s17 = sshll.u32 %s963_s1, 4  ;;  %s803_s18 = smov [#allocation6]   ;;  %s30_s17 = int_to_ptr.hbm [resolvable:$true] %s29_s17 }
   0x3   :  { %s31_s19 = sshll.u32 %s803_s18, 4  ;;  %s16_s22 = sshll.u32 %s962_s0, 4  ;;  %s32_s19 = int_to_ptr.vmem [resolvable:$true] %s31_s19  ;;  %s17_s22 = int_to_ptr.hbm [resolvable:$true] %s16_s22 }
   0x4   :  { %s804_s23 = smov 64   ;;  %s805_s24 = smov 4  }
   0x5   :  { %37 = dma.hbm_to_vmem [thread:$0]  %s30_s17, 1024, %s32_s19, [#allocation7], %s804_s23, %s804_s23, %s805_s24  }
   0x6   :  { %s806_s25 = smov [#allocation3]   ;;  %s42_s29 = sshll.u32 %s964_s2, 4  ;;  %s43_s29 = int_to_ptr.hbm [resolvable:$true] %s42_s29 }
   0x7   :  { %s18_s26 = sshll.u32 %s806_s25, 4  ;;  %s807_s1 = smov [#allocation8]   ;;  %s19_s26 = int_to_ptr.vmem [resolvable:$true] %s18_s26 }
   0x8   :  { %24 = dma.hbm_to_vmem [thread:$0]  %s17_s22, 1024, %s19_s26, [#allocation4], %s804_s23, %s804_s23, %s805_s24  }
   0x9   :  { %s44_s30 = sshll.u32 %s807_s1, 4  ;;  %s45_s30 = int_to_ptr.vmem [resolvable:$true] %s44_s30 }
   0xa   :  { %50 = dma.hbm_to_vmem [thread:$0]  %s43_s29, 1024, %s45_s30, [#allocation7], %s804_s23, %s804_s23, %s805_s24  }
   0xb   :  { %797 = dma.done.wait [#allocation4], 1024  }
   0xc   :  { %798 = vsyncadd [#allocation4], 4294966272 }
   0xd   :  { %799 = dma.done.wait [#allocation7], 2048  }
   0xe   :  { %800 = vsyncadd [#allocation7], 4294965248  ;;  %v642_v0 = vld [vmem:[#allocation6 + $0x38] sm:$0xff]  ;;  %v641_v2 = vld [vmem:[#allocation6 + $0x30] sm:$0xff]  ;;  %v808_v17 = vmov 0.0|0.0   ;;  %s517_s8 = sshll.u32 %s966_s4, 4  ;;  %s518_s8 = int_to_ptr.hbm [resolvable:$true] %s517_s8 }
   0xf   :  { %v846_v1 = vld [vmem:[#allocation8 + $0x38] sm:$0xff]  ;;  %203 = vmatpush.bf16.msra.mxu0 %v642_v0  ;;  %v849_v3 = vld [vmem:[#allocation8 + $0x30] sm:$0xff]  ;;  %651 = vmatpush.bf16.msra.mxu3 %v642_v0  ;;  %v640_v4 = vld [vmem:[#allocation6 + $0x28] sm:$0xff]  ;;  %s810_s9 = smov 128   ;;  %s811_s10 = smov 8  }
  0x10   :  { %337 = vmatpush.bf16.msra.mxu1 %v846_v1  ;;  %359 = vmatpush.bf16.msra.mxu2 %v846_v1  ;;  %v853_v5 = vld [vmem:[#allocation8 + $0x28] sm:$0xff]  ;;  %v639_v6 = vld [vmem:[#allocation6 + $0x20] sm:$0xff]  ;;  %v638_v8 = vld [vmem:[#allocation6 + $0x18] sm:$0xff] }
  0x11   :  { %v857_v7 = vld [vmem:[#allocation8 + $0x20] sm:$0xff]  ;;  %v861_v9 = vld [vmem:[#allocation8 + $0x18] sm:$0xff]  ;;  %v637_v10 = vld [vmem:[#allocation6 + $0x10] sm:$0xff] }
  0x12   :  { %v865_v11 = vld [vmem:[#allocation8 + $0x10] sm:$0xff]  ;;  %v636_v12 = vld [vmem:[#allocation6 + $0x8] sm:$0xff]  ;;  %v635_v14 = vld [vmem:[#allocation6] sm:$0xff] }
  0x13   :  { %204 = vmatpush.bf16.msra.mxu0 %v641_v2  ;;  %652 = vmatpush.bf16.msra.mxu3 %v641_v2  ;;  %v869_v13 = vld [vmem:[#allocation8 + $0x8] sm:$0xff]  ;;  %v873_v15 = vld [vmem:[#allocation8] sm:$0xff]  ;;  %v633_v19 = vld [vmem:[#allocation3 + $0x30] sm:$0xff] }
  0x14   :  { %338 = vmatpush.bf16.msra.mxu1 %v849_v3  ;;  %360 = vmatpush.bf16.msra.mxu2 %v849_v3  ;;  %v627_v16 = vld [vmem:[#allocation3] sm:$0xff]  ;;  %v628_v18 = vld [vmem:[#allocation3 + $0x8] sm:$0xff]  ;;  %v634_v32 = vld [vmem:[#allocation3 + $0x38] sm:$0xff] }
  0x15   :  { %v915_v20 = vld [vmem:[%s965_s3] ss:$0 sm:$0xff]  ;;  %v629_v33 = vld [vmem:[#allocation3 + $0x10] sm:$0xff]  ;;  %v630_v47 = vld [vmem:[#allocation3 + $0x18] sm:$0xff]  ;;  %s809_s3 = smov [#allocation9]  }
  0x16   :  { %v631_v61 = vld [vmem:[#allocation3 + $0x20] sm:$0xff]  ;;  %s515_s5 = sshll.u32 %s809_s3, 4  ;;  %s516_s5 = int_to_ptr.vmem [resolvable:$true] %s515_s5 }
  0x17   :  { %205 = vmatpush.bf16.msra.mxu0 %v640_v4  ;;  %653 = vmatpush.bf16.msra.mxu3 %v640_v4 }
  0x18   :  { %339 = vmatpush.bf16.msra.mxu1 %v853_v5  ;;  %361 = vmatpush.bf16.msra.mxu2 %v853_v5 }
  0x1b   :  { %206 = vmatpush.bf16.msra.mxu0 %v639_v6  ;;  %654 = vmatpush.bf16.msra.mxu3 %v639_v6 }
  0x1c   :  { %340 = vmatpush.bf16.msra.mxu1 %v857_v7  ;;  %362 = vmatpush.bf16.msra.mxu2 %v857_v7 }
  0x1f   :  { %207 = vmatpush.bf16.msra.mxu0 %v638_v8  ;;  %655 = vmatpush.bf16.msra.mxu3 %v638_v8 }
  0x20   :  { %341 = vmatpush.bf16.msra.mxu1 %v861_v9  ;;  %363 = vmatpush.bf16.msra.mxu2 %v861_v9 }
  0x23   :  { %208 = vmatpush.bf16.msra.mxu0 %v637_v10  ;;  %656 = vmatpush.bf16.msra.mxu3 %v637_v10 }
  0x24   :  { %342 = vmatpush.bf16.msra.mxu1 %v865_v11  ;;  %364 = vmatpush.bf16.msra.mxu2 %v865_v11 }
  0x27   :  { %209 = vmatpush.bf16.msra.mxu0 %v636_v12  ;;  %657 = vmatpush.bf16.msra.mxu3 %v636_v12 }
  0x28   :  { %343 = vmatpush.bf16.msra.mxu1 %v869_v13  ;;  %365 = vmatpush.bf16.msra.mxu2 %v869_v13 }
  0x2b   :  { %210 = vmatpush.bf16.msra.mxu0 %v635_v14  ;;  %658 = vmatpush.bf16.msra.mxu3 %v635_v14 }
  0x2c   :  { %344 = vmatpush.bf16.msra.mxu1 %v873_v15  ;;  %366 = vmatpush.bf16.msra.mxu2 %v873_v15 }
  0x2e   :  { %211 = vmatmul.bf16.vlgmr.msra.gmra.mxu0 %v627_v16  ;;  %241 = vmatmul.bf16.vlgmr.msra.gmra.mxu3 %v633_v19 }
  0x2f   :  { %381 = vmatpush.bf16.msrb.mxu3 %v846_v1  ;;  %345 = vmatmul.bf16.vlgmr.msra.gmra.mxu1 %v808_v17 }
  0x30   :  { %403 = vmatpush.bf16.msrb.mxu1 %v846_v1  ;;  %425 = vmatpush.bf16.msrb.mxu2 %v846_v1 }
  0x33   :  { %382 = vmatpush.bf16.msrb.mxu3 %v849_v3 }
  0x34   :  { %404 = vmatpush.bf16.msrb.mxu1 %v849_v3  ;;  %426 = vmatpush.bf16.msrb.mxu2 %v849_v3 }
  0x37   :  { %383 = vmatpush.bf16.msrb.mxu3 %v853_v5 }
  0x38   :  { %405 = vmatpush.bf16.msrb.mxu1 %v853_v5  ;;  %427 = vmatpush.bf16.msrb.mxu2 %v853_v5 }
  0x3b   :  { %384 = vmatpush.bf16.msrb.mxu3 %v857_v7 }
  0x3c   :  { %406 = vmatpush.bf16.msrb.mxu1 %v857_v7  ;;  %428 = vmatpush.bf16.msrb.mxu2 %v857_v7 }
  0x3e   :  { %216 = vmatmul.bf16.gmra.mxu0 %v628_v18  ;;  %246 = vmatmul.bf16.gmra.mxu3 %v634_v32 }
  0x3f   :  { %385 = vmatpush.bf16.msrb.mxu3 %v861_v9 }
  0x40   :  { %407 = vmatpush.bf16.msrb.mxu1 %v861_v9  ;;  %429 = vmatpush.bf16.msrb.mxu2 %v861_v9 }
  0x43   :  { %386 = vmatpush.bf16.msrb.mxu3 %v865_v11 }
  0x44   :  { %408 = vmatpush.bf16.msrb.mxu1 %v865_v11  ;;  %430 = vmatpush.bf16.msrb.mxu2 %v865_v11 }
  0x47   :  { %387 = vmatpush.bf16.msrb.mxu3 %v869_v13 }
  0x48   :  { %409 = vmatpush.bf16.msrb.mxu1 %v869_v13  ;;  %431 = vmatpush.bf16.msrb.mxu2 %v869_v13 }
  0x4b   :  { %388 = vmatpush.bf16.msrb.mxu3 %v873_v15 }
  0x4c   :  { %410 = vmatpush.bf16.msrb.mxu1 %v873_v15  ;;  %432 = vmatpush.bf16.msrb.mxu2 %v873_v15 }
  0x4e   :  { %221 = vmatmul.bf16.gmra.mxu0 %v629_v33 }
  0x4f   :  { %447 = vmatpush.bf16.msra.mxu3 %v846_v1 }
  0x50   :  { %469 = vmatpush.bf16.msra.mxu1 %v846_v1 }
  0x53   :  { %448 = vmatpush.bf16.msra.mxu3 %v849_v3 }
  0x54   :  { %470 = vmatpush.bf16.msra.mxu1 %v849_v3 }
  0x57   :  { %449 = vmatpush.bf16.msra.mxu3 %v853_v5 }
  0x58   :  { %471 = vmatpush.bf16.msra.mxu1 %v853_v5 }
  0x5b   :  { %450 = vmatpush.bf16.msra.mxu3 %v857_v7 }
  0x5c   :  { %472 = vmatpush.bf16.msra.mxu1 %v857_v7 }
  0x5e   :  { %226 = vmatmul.bf16.gmra.mxu0 %v630_v47 }
  0x5f   :  { %451 = vmatpush.bf16.msra.mxu3 %v861_v9 }
  0x60   :  { %473 = vmatpush.bf16.msra.mxu1 %v861_v9 }
  0x63   :  { %452 = vmatpush.bf16.msra.mxu3 %v865_v11 }
  0x64   :  { %474 = vmatpush.bf16.msra.mxu1 %v865_v11 }
  0x67   :  { %453 = vmatpush.bf16.msra.mxu3 %v869_v13 }
  0x68   :  { %475 = vmatpush.bf16.msra.mxu1 %v869_v13 }
  0x6b   :  { %454 = vmatpush.bf16.msra.mxu3 %v873_v15 }
  0x6c   :  { %476 = vmatpush.bf16.msra.mxu1 %v873_v15 }
  0x6e   :  { %231 = vmatmul.bf16.gmra.mxu0 %v631_v61 }
  0xab   :  { %v212_v21 = vpop.f32.mrf.mxu0 }
  0xac   :  { %v346_v22 = vpop.f32.mrf.mxu1  ;;  %v213_v23 = vadd.f32 %v915_v20, %v212_v21 }
  0xae   :  { %v351_v24 = vadd.f32 %v346_v22, %v213_v23 }
  0xb0   :  { %669 = vtanh.f32 %v351_v24 }
  0xb1   :  { %v935_v45 = vpop.f32.mrf.mxu3 }
  0xb3   :  { %v214_v25 = vpop.f32.mrf.mxu0 }
  0xb4   :  { %v215_v26 = vadd.f32 %v915_v20, %v214_v25  ;;  %v348_v27 = vpop.f32.mrf.mxu1 }
  0xb6   :  { %v352_v28 = vadd.f32 %v348_v27, %v215_v26  ;;  %v670_v29 = vpop.eup %669 }
  0xb8   :  { %671 = vtanh.f32 %v352_v28 }
  0xb9   :  { %v937_v46 = vpop.f32.mrf.mxu3 }
  0xbb   :  { %v217_v34 = vpop.f32.mrf.mxu0 }
  0xbc   :  { %v218_v36 = vadd.f32 %v915_v20, %v217_v34  ;;  %v243_v34 = vadd.f32 %v915_v20, %v935_v45 }
  0xbe   :  { %v672_v30 = vpop.eup %671 }
  0xbf   :  { %v358_v31 = vpack.c.bf16 %v672_v30, %v670_v29 }
  0xc1   :  { %367 = vmatmul.bf16.vlgmr.msra.gmra.mxu2 %v358_v31  ;;  %v939_v48 = vpop.f32.mrf.mxu3 }
  0xc2   :  { %491 = vmatpush.bf16.msra.mxu2 %v846_v1 }
  0xc3   :  { %v219_v37 = vpop.f32.mrf.mxu0 }
  0xc4   :  { %v220_v39 = vadd.f32 %v915_v20, %v219_v37 }
  0xc6   :  { %492 = vmatpush.bf16.msra.mxu2 %v849_v3 }
  0xc9   :  { %v941_v49 = vpop.f32.mrf.mxu3 }
  0xca   :  { %493 = vmatpush.bf16.msra.mxu2 %v853_v5  ;;  %v250_v45 = vadd.f32 %v915_v20, %v941_v49 }
  0xcb   :  { %v222_v50 = vpop.f32.mrf.mxu0 }
  0xcc   :  { %v223_v52 = vadd.f32 %v915_v20, %v222_v50 }
  0xce   :  { %494 = vmatpush.bf16.msra.mxu2 %v857_v7 }
  0xd2   :  { %495 = vmatpush.bf16.msra.mxu2 %v861_v9  ;;  %v632_v9 = vld [vmem:[#allocation3 + $0x28] sm:$0xff] }
  0xd3   :  { %v224_v53 = vpop.f32.mrf.mxu0  ;;  %236 = vmatmul.bf16.gmra.mxu0 %v632_v9 }
  0xd4   :  { %v225_v55 = vadd.f32 %v915_v20, %v224_v53 }
  0xd6   :  { %496 = vmatpush.bf16.msra.mxu2 %v865_v11 }
  0xda   :  { %497 = vmatpush.bf16.msra.mxu2 %v869_v13 }
  0xdb   :  { %v227_v62 = vpop.f32.mrf.mxu0 }
  0xdc   :  { %v228_v0 = vadd.f32 %v915_v20, %v227_v62 }
  0xde   :  { %498 = vmatpush.bf16.msra.mxu2 %v873_v15 }
  0xe3   :  { %v229_v1 = vpop.f32.mrf.mxu0 }
  0xe4   :  { %v230_v3 = vadd.f32 %v915_v20, %v229_v1 }
  0xeb   :  { %v232_v10 = vpop.f32.mrf.mxu0 }
  0xec   :  { %v233_v12 = vadd.f32 %v915_v20, %v232_v10 }
  0xf3   :  { %v234_v13 = vpop.f32.mrf.mxu0 }
  0xf4   :  { %v235_v15 = vadd.f32 %v915_v20, %v234_v13 }
 0x144   :  { %v368_v35 = vpop.f32.mrf.mxu2 }
 0x145   :  { %v373_v38 = vadd.f32 %v368_v35, %v218_v36  ;;  %v245_v36 = vadd.f32 %v915_v20, %v937_v46 }
 0x147   :  { %673 = vtanh.f32 %v373_v38 }
 0x14c   :  { %v370_v40 = vpop.f32.mrf.mxu2 }
 0x14d   :  { %v374_v41 = vadd.f32 %v370_v40, %v220_v39  ;;  %v674_v42 = vpop.eup %673 }
 0x14f   :  { %675 = vtanh.f32 %v374_v41 }
 0x150   :  { %v237_v22 = vpop.f32.mrf.mxu0 }
 0x151   :  { %v238_v24 = vadd.f32 %v915_v20, %v237_v22 }
 0x155   :  { %v676_v43 = vpop.eup %675 }
 0x156   :  { %v380_v44 = vpack.c.bf16 %v676_v43, %v674_v42  ;;  %v248_v42 = vadd.f32 %v915_v20, %v939_v48 }
 0x158   :  { %389 = vmatmul.bf16.vlgmr.msrb.gmra.mxu3 %v380_v44  ;;  %v239_v25 = vpop.f32.mrf.mxu0 }
 0x159   :  { %v240_v27 = vadd.f32 %v915_v20, %v239_v25 }
 0x1db   :  { %v390_v51 = vpop.f32.mrf.mxu3 }
 0x1dc   :  { %v395_v54 = vadd.f32 %v390_v51, %v223_v52 }
 0x1de   :  { %677 = vtanh.f32 %v395_v54 }
 0x1e3   :  { %v392_v56 = vpop.f32.mrf.mxu3 }
 0x1e4   :  { %v396_v57 = vadd.f32 %v392_v56, %v225_v55  ;;  %v678_v58 = vpop.eup %677 }
 0x1e6   :  { %679 = vtanh.f32 %v396_v57 }
 0x1ec   :  { %v680_v59 = vpop.eup %679 }
 0x1ed   :  { %v402_v60 = vpack.c.bf16 %v680_v59, %v678_v58 }
 0x1ef   :  { %411 = vmatmul.bf16.vlgmr.msrb.gmra.mxu1 %v402_v60 }
 0x26c   :  { %v412_v63 = vpop.f32.mrf.mxu1 }
 0x26d   :  { %v417_v2 = vadd.f32 %v412_v63, %v228_v0 }
 0x26f   :  { %681 = vtanh.f32 %v417_v2 }
 0x274   :  { %v414_v4 = vpop.f32.mrf.mxu1 }
 0x275   :  { %v418_v5 = vadd.f32 %v414_v4, %v230_v3  ;;  %v682_v6 = vpop.eup %681 }
 0x277   :  { %683 = vtanh.f32 %v418_v5 }
 0x27d   :  { %v684_v7 = vpop.eup %683 }
 0x27e   :  { %v424_v8 = vpack.c.bf16 %v684_v7, %v682_v6 }
 0x280   :  { %433 = vmatmul.bf16.vlgmr.msrb.gmra.mxu2 %v424_v8 }
 0x303   :  { %v434_v11 = vpop.f32.mrf.mxu2 }
 0x304   :  { %v439_v14 = vadd.f32 %v434_v11, %v233_v12 }
 0x306   :  { %685 = vtanh.f32 %v439_v14 }
 0x30b   :  { %v436_v16 = vpop.f32.mrf.mxu2 }
 0x30c   :  { %v440_v17 = vadd.f32 %v436_v16, %v235_v15  ;;  %v686_v18 = vpop.eup %685 }
 0x30e   :  { %687 = vtanh.f32 %v440_v17 }
 0x314   :  { %v688_v19 = vpop.eup %687 }
 0x315   :  { %v446_v21 = vpack.c.bf16 %v688_v19, %v686_v18 }
 0x317   :  { %455 = vmatmul.bf16.vlgmr.msra.gmra.mxu3 %v446_v21 }
 0x39a   :  { %v456_v23 = vpop.f32.mrf.mxu3 }
 0x39b   :  { %v461_v26 = vadd.f32 %v456_v23, %v238_v24 }
 0x39d   :  { %689 = vtanh.f32 %v461_v26 }
 0x3a2   :  { %v458_v28 = vpop.f32.mrf.mxu3 }
 0x3a3   :  { %v462_v29 = vadd.f32 %v458_v28, %v240_v27  ;;  %v690_v30 = vpop.eup %689 }
 0x3a5   :  { %691 = vtanh.f32 %v462_v29 }
 0x3ab   :  { %v692_v31 = vpop.eup %691 }
 0x3ac   :  { %v468_v32 = vpack.c.bf16 %v692_v31, %v690_v30 }
 0x3ae   :  { %477 = vmatmul.bf16.vlgmr.msra.gmra.mxu1 %v468_v32 }
 0x42b   :  { %v478_v33 = vpop.f32.mrf.mxu1 }
 0x42c   :  { %v483_v35 = vadd.f32 %v478_v33, %v243_v34 }
 0x42e   :  { %693 = vtanh.f32 %v483_v35 }
 0x433   :  { %v480_v37 = vpop.f32.mrf.mxu1 }
 0x434   :  { %v484_v38 = vadd.f32 %v480_v37, %v245_v36  ;;  %v694_v39 = vpop.eup %693 }
 0x436   :  { %695 = vtanh.f32 %v484_v38 }
 0x43c   :  { %v696_v40 = vpop.eup %695 }
 0x43d   :  { %v490_v41 = vpack.c.bf16 %v696_v40, %v694_v39 }
 0x43f   :  { %499 = vmatmul.bf16.vlgmr.msra.gmra.mxu2 %v490_v41 }
 0x4c2   :  { %v500_v43 = vpop.f32.mrf.mxu2 }
 0x4c3   :  { %v505_v44 = vadd.f32 %v500_v43, %v248_v42 }
 0x4c5   :  { %697 = vtanh.f32 %v505_v44 }
 0x4ca   :  { %v502_v47 = vpop.f32.mrf.mxu2 }
 0x4cb   :  { %v698_v50 = vpop.eup %697  ;;  %v506_v46 = vadd.f32 %v502_v47, %v250_v45 }
 0x4cc   :  { %509 = vst [vmem:[#allocation9] sm:$0xff] %v698_v50 }
 0x4cd   :  { %699 = vtanh.f32 %v506_v46 }
 0x4d3   :  { %v700_v48 = vpop.eup %699 }
 0x4d4   :  { %510 = vst [vmem:[#allocation9 + $0x8] sm:$0xff] %v700_v48 }
 0x4d5   :  { %523 = dma.vmem_to_hbm [thread:$0]  %s516_s5, 256, %s518_s8, [#allocation5], %s810_s9, %s810_s9, %s811_s10  }
 0x4d6   :  { %801 = dma.done.wait [#allocation5], 256  }
 0x4d7   :  { %802 = vsyncadd [#allocation5], 4294967040 }
 0x4d8   :  { %528 = vsyncpa [#allocation4], 1 }
 0x4d9   :  { %529 = vsyncpa [#allocation7], 1 }
 0x4da   :  { %530 = vsyncpa [#allocation5], 1 }

</bundles_post_ra>
